<compile_context>
chip_gen: v7x
topology: tpu7x:2x2x1
jax: 0.10.0
libtpu: 0.0.40
codegen_flags: <defaults>
</compile_context>

<pallas_src>
from functools import partial

import jax
import jax.numpy as jnp
from jax.experimental import pallas as pl
from jax.experimental.pallas import tpu as pltpu


def _round_up(x, m):
    return ((x + m - 1) // m) * m


# ---------------------------------------------------------------------------
# Kernels
# ---------------------------------------------------------------------------

def _fused_kernel_dense(x_ref, w_ref, vecs_ref, out_ref, *, eps):
    """One batch tile, E >= 128: y = LayerNorm(x @ W_fused + b_fused + x)."""
    x = x_ref[...].astype(jnp.float32)                       # (TILE, E)
    b     = vecs_ref[0:1, :].astype(jnp.float32)             # (1, E)
    gamma = vecs_ref[1:2, :].astype(jnp.float32)
    beta  = vecs_ref[2:3, :].astype(jnp.float32)

    proj = jnp.dot(x.astype(w_ref.dtype), w_ref[...],
                   preferred_element_type=jnp.float32)       # MXU, f32 accum
    y = proj + b + x
    mu = jnp.mean(y, axis=-1, keepdims=True)
    ym = y - mu
    var = jnp.mean(ym * ym, axis=-1, keepdims=True)
    out_ref[...] = ((ym * jax.lax.rsqrt(var + eps)) * gamma + beta
                    ).astype(out_ref.dtype)


def _fused_kernel_packed(x_ref, w_ref, vecs_ref, seg_ref, out_ref, *, eps):
    """Lane-dense variant for E < 128: `pack` original rows live in one
    (rows, pack*E = 128) slab, W is block-diagonal, and the per-row LayerNorm
    mean/var become segmented reductions done as an MXU matmul against a
    block-diagonal (1/E) matrix (keeps lanes dense, stores unmasked)."""
    x = x_ref[...].astype(jnp.float32)                       # (TILE, Ep)
    b     = vecs_ref[0:1, :].astype(jnp.float32)             # (1, Ep)
    gamma = vecs_ref[1:2, :].astype(jnp.float32)
    beta  = vecs_ref[2:3, :].astype(jnp.float32)

    proj = jnp.dot(x.astype(w_ref.dtype), w_ref[...],
                   preferred_element_type=jnp.float32)       # MXU, f32 accum
    y = proj + b + x
    seg = seg_ref[...]                                       # (Ep, Ep), blocks of 1/E
    mu = jnp.dot(y, seg, preferred_element_type=jnp.float32)        # segment mean
    ym = y - mu
    var = jnp.dot(ym * ym, seg, preferred_element_type=jnp.float32)  # segment var
    out_ref[...] = ((ym * jax.lax.rsqrt(var + eps)) * gamma + beta
                    ).astype(out_ref.dtype)


# ---------------------------------------------------------------------------
# Parameter preparation (hoisted out of the per-call path)
# ---------------------------------------------------------------------------

def prepare_params(params, *, weights_dtype=jnp.bfloat16, eps=1e-5):
    """Precompute fused weights once (parameter-load time, not per forward).

    Exact because seq_len == 1 (softmax over one key is 1) and the module's
    forward has no attention dropout / key_padding_mask."""
    wv = params["wv"].astype(jnp.float32)
    wo = params["wo"].astype(jnp.float32)
    E = wv.shape[0]
    w_fused = wv @ wo                                                # f32 accumulate
    b_fused = params["bv"].astype(jnp.float32) @ wo + params["bo"]   # (1, E)
    gamma, beta = params["gamma"], params["beta"]

    # lane-dense repacking factor: pack rows so the feature axis is 128 wide
    pack = 128 // E if (E < 128 and 128 % E == 0) else 1
    Ep = pack * E
    if pack > 1:
        eye = jnp.eye(pack, dtype=jnp.float32)
        w_big   = jnp.kron(eye, w_fused)                             # block-diag (Ep, Ep)
        b_big   = jnp.tile(b_fused, (1, pack))
        gamma_b = jnp.tile(gamma, (1, pack))
        beta_b  = jnp.tile(beta, (1, pack))
        seg = jnp.kron(eye, jnp.full((E, E), 1.0 / E, jnp.float32))  # segmented-mean matrix
    else:
        w_big, b_big, gamma_b, beta_b, seg = w_fused, b_fused, gamma, beta, None

    vecs = jnp.concatenate([b_big, gamma_b, beta_b], axis=0).astype(jnp.float32)
    return {
        "w": w_big.astype(weights_dtype),   # bf16 by default: MXU-native, half HBM/VMEM
        "vecs": vecs,                       # (3, Ep): b_fused / gamma / beta
        "seg": seg,                         # (Ep, Ep) or None
        "pack": pack, "E": E, "Ep": Ep, "eps": eps,
    }


# ---------------------------------------------------------------------------
# Tiling / pallas_call wrapper
# ---------------------------------------------------------------------------

def _choose_tile(rows, Ep, w_bytes, seg_bytes):
    """Pick the batch tile (sublane dim). Big tiles amortize the ~0.35us/step
    overhead (>=512 rows ~85% of HBM roofline); when the batch is large enough
    we force >= 2 grid steps so the 'parallel' axis shards across v7x's 2 TCs."""
    if rows < 16:
        return rows, rows                           # single step; block == full array dim
    rows8 = _round_up(rows, 8)
    budget = 40 * 1024 * 1024                       # conservative across v5e/v6e/v7x
    fixed = w_bytes + seg_bytes + 8 * Ep * 4        # single-buffered residents
    avail = max(budget - fixed, 2 * 1024 * 1024)
    tile_vmem = max(8, (avail // (Ep * 4 * 2 * 2)) // 8 * 8)   # x+out, double-buffered f32
    tile = max(8, min(1024, tile_vmem, _round_up(pl.cdiv(rows8, 2), 8)))
    rows_p = _round_up(rows8, tile)
    return tile, rows_p


def _pallas_forward(xp, prepped, tile, grid, vmem_limit):
    Ep = prepped["Ep"]
    packed = prepped["pack"] > 1
    eps = prepped["eps"]

    def build(resident_kw):
        in_specs = [
            pl.BlockSpec((tile, Ep), lambda i: (i, 0)),                   # x: streamed
            pl.BlockSpec((Ep, Ep), lambda i: (0, 0), **resident_kw),      # weight: resident
            pl.BlockSpec((3, Ep), lambda i: (0, 0), **resident_kw),       # b/gamma/beta
        ]
        args = [xp, prepped["w"], prepped["vecs"]]
        if packed:
            in_specs.append(pl.BlockSpec((Ep, Ep), lambda i: (0, 0), **resident_kw))
            args.append(prepped["seg"])
            kernel = partial(_fused_kernel_packed, eps=eps)
        else:
            kernel = partial(_fused_kernel_dense, eps=eps)
        return pl.pallas_call(
            kernel,
            out_shape=jax.ShapeDtypeStruct((xp.shape[0], Ep), xp.dtype),
            grid=grid,
            in_specs=in_specs,
            out_specs=pl.BlockSpec((tile, Ep), lambda i: (i, 0)),
            compiler_params=pltpu.CompilerParams(
                dimension_semantics=("parallel",),       # dual-TC sharding on v7x
                vmem_limit_bytes=vmem_limit),
        )(*args)

    try:
        # grid-invariant inputs single-buffered (constant index_map) -> halve VMEM
        return build({"pipeline_mode": pl.Buffered(1)})
    except Exception:
        # fall back to default double-buffering if this JAX build rejects Buffered(1)
        return build({})


def attention_layer(x, prepped):
    """x: (B, E) float.  prepped: output of prepare_params (fused, precomputed)."""
    B, E = x.shape
    assert E == prepped["E"]
    pack, Ep = prepped["pack"], prepped["Ep"]

    # lane-dense repack: (B, E) -> (rows, pack*E); pad batch with zero rows
    Bp = _round_up(B, pack)
    x_in = jnp.pad(x, ((0, Bp - B), (0, 0))) if Bp != B else x
    rows = Bp // pack
    xp = x_in.reshape(rows, Ep)

    w_bytes = prepped["w"].size * prepped["w"].dtype.itemsize
    seg_bytes = 0 if prepped["seg"] is None else prepped["seg"].size * 4
    tile, rows_p = _choose_tile(rows, Ep, w_bytes, seg_bytes)
    if rows_p != rows:
        xp = jnp.pad(xp, ((0, rows_p - rows), (0, 0)))     # zero pad: no NaNs in mean/var
    grid = (rows_p // tile,)

    stream_bytes = tile * Ep * 4 * 2 * 2                   # x + out, double-buffered, f32
    vmem_limit = int(1.5 * (w_bytes + seg_bytes + 8 * Ep * 4 + stream_bytes)) + (2 << 20)
    vmem_limit = int(min(max(vmem_limit, 8 << 20), 100 << 20))

    out = _pallas_forward(xp, prepped, tile, grid, vmem_limit)
    return out[:rows].reshape(Bp, E)[:B]


# ---------------------------------------------------------------------------
# Pure-JAX reference & synthetic parameters
# ---------------------------------------------------------------------------

def reference(x, params, *, num_heads=4, eps=1e-5):
    """Mirrors nn.MultiheadAttention (seq=1, batch_first) + residual + LayerNorm."""
    B, E = x.shape
    H = num_heads
    Dh = E // H
    q = x @ params["wq"] + params["bq"][0]
    k = x @ params["wk"] + params["bk"][0]
    v = x @ params["wv"] + params["bv"][0]
    qh = q.reshape(B, H, Dh)
    kh = k.reshape(B, H, Dh)
    vh = v.reshape(B, H, Dh)
    scores = jnp.sum(qh * kh, axis=-1, keepdims=True) / jnp.sqrt(jnp.float32(Dh))
    w = jax.nn.softmax(scores, axis=-1)                    # identically 1 (seq len 1)
    attn = (w * vh).reshape(B, E)
    proj = attn @ params["wo"] + params["bo"][0]
    y = proj + x
    mu = y.mean(-1, keepdims=True)
    var = ((y - mu) ** 2).mean(-1, keepdims=True)
    return (y - mu) / jnp.sqrt(var + eps) * params["gamma"][0] + params["beta"][0]


def make_params(key, embed_dim):
    """Synthetic parameters matching nn.MultiheadAttention/LayerNorm shapes."""
    E = embed_dim
    ks = jax.random.split(key, 6)
    in_proj_w = 0.05 * jax.random.normal(ks[0], (3 * E, E), jnp.float32)
    in_proj_b = 0.05 * jax.random.normal(ks[1], (3 * E,), jnp.float32)
    out_w = 0.05 * jax.random.normal(ks[2], (E, E), jnp.float32)
    out_b = 0.05 * jax.random.normal(ks[3], (E,), jnp.float32)
    gamma = 1.0 + 0.1 * jax.random.normal(ks[4], (E,), jnp.float32)
    beta = 0.1 * jax.random.normal(ks[5], (E,), jnp.float32)
    # pre-transpose so math is x @ W (PyTorch does x @ W.T)
    return {
        "wq": in_proj_w[:E].T, "wk": in_proj_w[E:2 * E].T, "wv": in_proj_w[2 * E:].T,
        "bq": in_proj_b[:E][None, :], "bk": in_proj_b[E:2 * E][None, :],
        "bv": in_proj_b[2 * E:][None, :],
        "wo": out_w.T, "bo": out_b[None, :],
        "gamma": gamma[None, :], "beta": beta[None, :],
    }


if __name__ == "__main__":
    key = jax.random.PRNGKey(0)
    k_x, k_p, k_x2, k_p3, k_x3 = jax.random.split(key, 5)

    # --- primary small demo: batch=8, embed_dim=32, num_heads=4 -------------
    B, E, H = 8, 32, 4
    x = jax.random.normal(k_x, (B, E), jnp.float32)
    params = make_params(k_p, E)
    ref = reference(x, params, num_heads=H)

    # default path: bf16 fused weight (loose tolerance due to bf16 matmul)
    prepped_bf16 = prepare_params(params)
    out = jax.block_until_ready(attention_layer(x, prepped_bf16))
    assert out.shape == (B, E)
    assert jnp.allclose(out, ref, atol=2e-2, rtol=0), (
        f"bf16 max abs err = {jnp.max(jnp.abs(out - ref))}")

    # f32 weights: tight numeric check of the fused semantics
    prepped_f32 = prepare_params(params, weights_dtype=jnp.float32)
    out32 = jax.block_until_ready(attention_layer(x, prepped_f32))
    assert jnp.allclose(out32, ref, atol=1e-4, rtol=1e-4), (
        f"f32 max abs err = {jnp.max(jnp.abs(out32 - ref))}")

    # --- larger batch: exercises packing remainder, row padding, multi-step grid
    B2 = 301
    x2 = jax.random.normal(k_x2, (B2, E), jnp.float32)
    ref2 = reference(x2, params, num_heads=H)
    out2 = jax.block_until_ready(attention_layer(x2, prepped_f32))
    assert out2.shape == (B2, E)
    assert jnp.allclose(out2, ref2, atol=1e-4, rtol=1e-4), (
        f"big-batch max abs err = {jnp.max(jnp.abs(out2 - ref2))}")

    # --- E >= 128: dense (non-packed) kernel path ----------------------------
    E3, B3 = 128, 48
    params3 = make_params(k_p3, E3)
    x3 = jax.random.normal(k_x3, (B3, E3), jnp.float32)
    ref3 = reference(x3, params3, num_heads=H)
    out3 = jax.block_until_ready(
        attention_layer(x3, prepare_params(params3, weights_dtype=jnp.float32)))
    assert jnp.allclose(out3, ref3, atol=1e-4, rtol=1e-4), (
        f"E=128 max abs err = {jnp.max(jnp.abs(out3 - ref3))}")

    print("KERNEL_OK")
</pallas_src>

<mosaic_0001>
module attributes {stable_mosaic.version = 11 : i64} {
  func.func @_fused_kernel_packed(%arg0: i32, %arg1: memref<2x128xf32, #tpu.memory_space<vmem>>, %arg2: memref<128x128xbf16, #tpu.memory_space<vmem>>, %arg3: memref<3x128xf32, #tpu.memory_space<vmem>>, %arg4: memref<128x128xf32, #tpu.memory_space<vmem>>, %arg5: memref<2x128xf32, #tpu.memory_space<vmem>>) attributes {dimension_semantics = [#tpu.dimension_semantics<parallel>], iteration_bounds = array<i64: 1>, scalar_prefetch = 0 : i64, scratch_operands = 0 : i64, tpu.core_type = #tpu.core_type<tc>, window_params = [{transform_indices = @transform_0, window_bounds = array<i64: 2, 128>}, {pipeline_mode = #tpu.pipeline_mode<synchronous>, transform_indices = @transform_1, window_bounds = array<i64: 128, 128>}, {pipeline_mode = #tpu.pipeline_mode<synchronous>, transform_indices = @transform_2, window_bounds = array<i64: 3, 128>}, {pipeline_mode = #tpu.pipeline_mode<synchronous>, transform_indices = @transform_3, window_bounds = array<i64: 128, 128>}, {transform_indices = @transform_4, window_bounds = array<i64: 2, 128>}]} {
    %c0 = arith.constant 0 : index
    %c0_0 = arith.constant 0 : index
    %0 = vector.load %arg1[%c0, %c0_0] : memref<2x128xf32, #tpu.memory_space<vmem>>, vector<2x128xf32>
    %c0_1 = arith.constant 0 : index
    %c0_2 = arith.constant 0 : index
    %1 = vector.load %arg3[%c0_1, %c0_2] : memref<3x128xf32, #tpu.memory_space<vmem>>, vector<1x128xf32>
    %c1 = arith.constant 1 : index
    %c0_3 = arith.constant 0 : index
    %2 = vector.load %arg3[%c1, %c0_3] : memref<3x128xf32, #tpu.memory_space<vmem>>, vector<1x128xf32>
    %c2 = arith.constant 2 : index
    %c0_4 = arith.constant 0 : index
    %3 = vector.load %arg3[%c2, %c0_4] : memref<3x128xf32, #tpu.memory_space<vmem>>, vector<1x128xf32>
    %4 = arith.truncf %0 : vector<2x128xf32> to vector<2x128xbf16>
    %c0_5 = arith.constant 0 : index
    %c0_6 = arith.constant 0 : index
    %5 = vector.load %arg2[%c0_5, %c0_6] : memref<128x128xbf16, #tpu.memory_space<vmem>>, vector<128x128xbf16>
    %cst = arith.constant dense<0.000000e+00> : vector<2x128xf32>
    %6 = tpu.matmul %4, %5, %cst {dimension_numbers = #tpu.dot_dimension_numbers<[1], [0], [0], [1], [0, 0, 1, 1], [], []>} : vector<2x128xbf16>, vector<128x128xbf16>, vector<2x128xf32> -> vector<2x128xf32>
    %7 = vector.broadcast %1 : vector<1x128xf32> to vector<2x128xf32>
    %8 = arith.addf %6, %7 : vector<2x128xf32>
    %9 = arith.addf %8, %0 : vector<2x128xf32>
    %c0_7 = arith.constant 0 : index
    %c0_8 = arith.constant 0 : index
    %10 = vector.load %arg4[%c0_7, %c0_8] : memref<128x128xf32, #tpu.memory_space<vmem>>, vector<128x128xf32>
    %cst_9 = arith.constant dense<0.000000e+00> : vector<2x128xf32>
    %11 = tpu.matmul %9, %10, %cst_9 {dimension_numbers = #tpu.dot_dimension_numbers<[1], [0], [0], [1], [0, 0, 1, 1], [], []>} : vector<2x128xf32>, vector<128x128xf32>, vector<2x128xf32> -> vector<2x128xf32>
    %12 = arith.subf %9, %11 : vector<2x128xf32>
    %13 = arith.mulf %12, %12 : vector<2x128xf32>
    %cst_10 = arith.constant dense<0.000000e+00> : vector<2x128xf32>
    %14 = tpu.matmul %13, %10, %cst_10 {dimension_numbers = #tpu.dot_dimension_numbers<[1], [0], [0], [1], [0, 0, 1, 1], [], []>} : vector<2x128xf32>, vector<128x128xf32>, vector<2x128xf32> -> vector<2x128xf32>
    %cst_11 = arith.constant 9.99999974E-6 : f32
    %15 = vector.broadcast %cst_11 : f32 to vector<2x128xf32>
    %16 = arith.addf %14, %15 : vector<2x128xf32>
    %17 = math.rsqrt %16 : vector<2x128xf32>
    %18 = arith.mulf %12, %17 : vector<2x128xf32>
    %19 = vector.broadcast %2 : vector<1x128xf32> to vector<2x128xf32>
    %20 = arith.mulf %18, %19 : vector<2x128xf32>
    %21 = vector.broadcast %3 : vector<1x128xf32> to vector<2x128xf32>
    %22 = arith.addf %20, %21 : vector<2x128xf32>
    %c0_12 = arith.constant 0 : index
    %c0_13 = arith.constant 0 : index
    %23 = vector.load %arg5[%c0_12, %c0_13] : memref<2x128xf32, #tpu.memory_space<vmem>>, vector<2x128xf32>
    tpu.vector_store %arg5[%c0_12, %c0_13], %22 {strides = array<i32>} : memref<2x128xf32, #tpu.memory_space<vmem>>, vector<2x128xf32>,
    return
  }
  func.func @transform_0(%arg0: i32) -> (i32, i32) {
    %c0_i32 = arith.constant 0 : i32
    %c0_i32_0 = arith.constant 0 : i32
    return %arg0, %c0_i32 : i32, i32
  }
  func.func @transform_1(%arg0: i32) -> (i32, i32) {
    %c0_i32 = arith.constant 0 : i32
    %c0_i32_0 = arith.constant 0 : i32
    %c0_i32_1 = arith.constant 0 : i32
    return %c0_i32, %c0_i32_0 : i32, i32
  }
  func.func @transform_2(%arg0: i32) -> (i32, i32) {
    %c0_i32 = arith.constant 0 : i32
    %c0_i32_0 = arith.constant 0 : i32
    %c0_i32_1 = arith.constant 0 : i32
    return %c0_i32, %c0_i32_0 : i32, i32
  }
  func.func @transform_3(%arg0: i32) -> (i32, i32) {
    %c0_i32 = arith.constant 0 : i32
    %c0_i32_0 = arith.constant 0 : i32
    %c0_i32_1 = arith.constant 0 : i32
    return %c0_i32, %c0_i32_0 : i32, i32
  }
  func.func @transform_4(%arg0: i32) -> (i32, i32) {
    %c0_i32 = arith.constant 0 : i32
    %c0_i32_0 = arith.constant 0 : i32
    return %arg0, %c0_i32 : i32, i32
  }
}

module attributes {stable_mosaic.version = 11 : i64} {
  func.func @_fused_kernel_packed(%arg0: i32, %arg1: memref<2x128xf32, #tpu.memory_space<vmem>>, %arg2: memref<128x128xbf16, #tpu.memory_space<vmem>>, %arg3: memref<3x128xf32, #tpu.memory_space<vmem>>, %arg4: memref<128x128xf32, #tpu.memory_space<vmem>>, %arg5: memref<2x128xf32, #tpu.memory_space<vmem>>) attributes {dimension_semantics = [#tpu.dimension_semantics<parallel>], iteration_bounds = array<i64: 1>, scalar_prefetch = 0 : i64, scratch_operands = 0 : i64, tpu.core_type = #tpu.core_type<tc>, window_params = [{transform_indices = @transform_0, window_bounds = array<i64: 2, 128>}, {pipeline_mode = #tpu.pipeline_mode<synchronous>, transform_indices = @transform_1, window_bounds = array<i64: 128, 128>}, {pipeline_mode = #tpu.pipeline_mode<synchronous>, transform_indices = @transform_2, window_bounds = array<i64: 3, 128>}, {pipeline_mode = #tpu.pipeline_mode<synchronous>, transform_indices = @transform_3, window_bounds = array<i64: 128, 128>}, {transform_indices = @transform_4, window_bounds = array<i64: 2, 128>}]} {
    %c0 = arith.constant 0 : index
    %c0_0 = arith.constant 0 : index
    %0 = vector.load %arg1[%c0, %c0_0] : memref<2x128xf32, #tpu.memory_space<vmem>>, vector<2x128xf32>
    %c0_1 = arith.constant 0 : index
    %c0_2 = arith.constant 0 : index
    %1 = vector.load %arg3[%c0_1, %c0_2] : memref<3x128xf32, #tpu.memory_space<vmem>>, vector<1x128xf32>
    %c1 = arith.constant 1 : index
    %c0_3 = arith.constant 0 : index
    %2 = vector.load %arg3[%c1, %c0_3] : memref<3x128xf32, #tpu.memory_space<vmem>>, vector<1x128xf32>
    %c2 = arith.constant 2 : index
    %c0_4 = arith.constant 0 : index
    %3 = vector.load %arg3[%c2, %c0_4] : memref<3x128xf32, #tpu.memory_space<vmem>>, vector<1x128xf32>
    %4 = arith.truncf %0 : vector<2x128xf32> to vector<2x128xbf16>
    %c0_5 = arith.constant 0 : index
    %c0_6 = arith.constant 0 : index
    %5 = vector.load %arg2[%c0_5, %c0_6] : memref<128x128xbf16, #tpu.memory_space<vmem>>, vector<128x128xbf16>
    %cst = arith.constant dense<0.000000e+00> : vector<2x128xf32>
    %6 = tpu.matmul %4, %5, %cst {dimension_numbers = #tpu.dot_dimension_numbers<[1], [0], [0], [1], [0, 0, 1, 1], [], []>} : vector<2x128xbf16>, vector<128x128xbf16>, vector<2x128xf32> -> vector<2x128xf32>
    %7 = vector.broadcast %1 : vector<1x128xf32> to vector<2x128xf32>
    %8 = arith.addf %6, %7 : vector<2x128xf32>
    %9 = arith.addf %8, %0 : vector<2x128xf32>
    %c0_7 = arith.constant 0 : index
    %c0_8 = arith.constant 0 : index
    %10 = vector.load %arg4[%c0_7, %c0_8] : memref<128x128xf32, #tpu.memory_space<vmem>>, vector<128x128xf32>
    %cst_9 = arith.constant dense<0.000000e+00> : vector<2x128xf32>
    %11 = tpu.matmul %9, %10, %cst_9 {dimension_numbers = #tpu.dot_dimension_numbers<[1], [0], [0], [1], [0, 0, 1, 1], [], []>} : vector<2x128xf32>, vector<128x128xf32>, vector<2x128xf32> -> vector<2x128xf32>
    %12 = arith.subf %9, %11 : vector<2x128xf32>
    %13 = arith.mulf %12, %12 : vector<2x128xf32>
    %cst_10 = arith.constant dense<0.000000e+00> : vector<2x128xf32>
    %14 = tpu.matmul %13, %10, %cst_10 {dimension_numbers = #tpu.dot_dimension_numbers<[1], [0], [0], [1], [0, 0, 1, 1], [], []>} : vector<2x128xf32>, vector<128x128xf32>, vector<2x128xf32> -> vector<2x128xf32>
    %cst_11 = arith.constant 9.99999974E-6 : f32
    %15 = vector.broadcast %cst_11 : f32 to vector<2x128xf32>
    %16 = arith.addf %14, %15 : vector<2x128xf32>
    %17 = math.rsqrt %16 : vector<2x128xf32>
    %18 = arith.mulf %12, %17 : vector<2x128xf32>
    %19 = vector.broadcast %2 : vector<1x128xf32> to vector<2x128xf32>
    %20 = arith.mulf %18, %19 : vector<2x128xf32>
    %21 = vector.broadcast %3 : vector<1x128xf32> to vector<2x128xf32>
    %22 = arith.addf %20, %21 : vector<2x128xf32>
    %c0_12 = arith.constant 0 : index
    %c0_13 = arith.constant 0 : index
    %23 = vector.load %arg5[%c0_12, %c0_13] : memref<2x128xf32, #tpu.memory_space<vmem>>, vector<2x128xf32>
    tpu.vector_store %arg5[%c0_12, %c0_13], %22 {strides = array<i32>} : memref<2x128xf32, #tpu.memory_space<vmem>>, vector<2x128xf32>,
    return
  }
  func.func @transform_0(%arg0: i32) -> (i32, i32) {
    %c0_i32 = arith.constant 0 : i32
    %c0_i32_0 = arith.constant 0 : i32
    return %arg0, %c0_i32 : i32, i32
  }
  func.func @transform_1(%arg0: i32) -> (i32, i32) {
    %c0_i32 = arith.constant 0 : i32
    %c0_i32_0 = arith.constant 0 : i32
    %c0_i32_1 = arith.constant 0 : i32
    return %c0_i32, %c0_i32_0 : i32, i32
  }
  func.func @transform_2(%arg0: i32) -> (i32, i32) {
    %c0_i32 = arith.constant 0 : i32
    %c0_i32_0 = arith.constant 0 : i32
    %c0_i32_1 = arith.constant 0 : i32
    return %c0_i32, %c0_i32_0 : i32, i32
  }
  func.func @transform_3(%arg0: i32) -> (i32, i32) {
    %c0_i32 = arith.constant 0 : i32
    %c0_i32_0 = arith.constant 0 : i32
    %c0_i32_1 = arith.constant 0 : i32
    return %c0_i32, %c0_i32_0 : i32, i32
  }
  func.func @transform_4(%arg0: i32) -> (i32, i32) {
    %c0_i32 = arith.constant 0 : i32
    %c0_i32_0 = arith.constant 0 : i32
    return %arg0, %c0_i32 : i32, i32
  }
}

</mosaic_0001>

<bundles_post_ra>
// kernel: tpu_custom_call.1
= control target key start
LH: loop header
LB: loop body
LE: loop exit
PB: predicated region body
PF: predicated region fallthrough
CT: control target
= control target key end

     0   :  { %9 = vsyncpa [#allocation3], 0  ;;  %s789_s0 = inlined_call_operand.hbm [shape: f32[2,128], index: 0, kind: input, shape index: {}]   ;;  %s790_s1 = inlined_call_operand.hbm [shape: bf16[128,128], index: 1, kind: input, shape index: {}]   ;;  %s791_s2 = inlined_call_operand.vmem [shape: f32[3,128], index: 2, kind: input, shape index: {}]   ;;  %s792_s3 = inlined_call_operand.hbm [shape: f32[128,128], index: 3, kind: input, shape index: {}]   ;;  %s793_s4 = inlined_call_operand.hbm [shape: f32[2,128], index: 4, kind: output, shape index: {}]  }
   0x1   :  { %10 = vsyncpa [#allocation6], 0 }
   0x2   :  { %11 = vsyncpa [#allocation4], 0  ;;  %s666_s15 = smov [#allocation5]   ;;  %s572_s19 = scalar_lea.hbm %s790_s1, 1024 }
   0x3   :  { %s27_s16 = sshll.u32 %s666_s15, 4  ;;  %p573_p0 = scmp.ne.s32.totalorder %s790_s1, %s572_s19  ;;  %s28_s16 = int_to_ptr.vmem [resolvable:$true] %s27_s16 }
   0x4   :  { %p576_p1 = scmp.lt.u32.totalorder %s572_s19, %s790_s1 }
   0x6   :  { %p578_p2 = pnand %p576_p1, %p573_p0 }
   0x8   :  { %581 = shalt.err (!%p578_p2)
}
   0x9   :  { %s582_s24 = scalar_lea.vmem %s28_s16, 1024  ;;  %p587_p4 = scmp.lt.s32.totalorder %s28_s16, %s28_s16 }
   0xa   :  { %p583_p3 = scmp.ne.s32.totalorder %s28_s16, %s582_s24  ;;  %p588_p5 = scmp.lt.s32.totalorder %s582_s24, %s582_s24 }
   0xc   :  { %p589_p6 = por %p588_p5, %p587_p4 }
   0xe   :  { %p590_p7 = pnand %p589_p6, %p583_p3 }
  0x10   :  { %593 = shalt.err (!%p590_p7)
}
  0x11   :  { %s667_s25 = smov 64   ;;  %s668_s26 = smov 4  }
  0x12   :  { %33 = dma.hbm_to_vmem [thread:$0]  %s790_s1, 1024, %s28_s16, [#allocation6], %s667_s25, %s667_s25, %s668_s26  }
  0x13   :  { %s669_s29 = smov [#allocation2]   ;;  %s670_s5 = smov [#allocation7]  }
  0x14   :  { %s18_s30 = sshll.u32 %s669_s29, 4  ;;  %s41_s6 = sshll.u32 %s670_s5, 4  ;;  %s19_s30 = int_to_ptr.vmem [resolvable:$true] %s18_s30  ;;  %s42_s6 = int_to_ptr.vmem [resolvable:$true] %s41_s6 }
  0x15   :  { %s594_s9 = scalar_lea.hbm %s789_s0, 32 }
  0x16   :  { %p595_p8 = scmp.ne.s32.totalorder %s789_s0, %s594_s9  ;;  %p598_p9 = scmp.lt.u32.totalorder %s594_s9, %s789_s0 }
  0x18   :  { %p600_p10 = pnand %p598_p9, %p595_p8 }
  0x1a   :  { %603 = shalt.err (!%p600_p10)
}
  0x1b   :  { %s604_s1 = scalar_lea.vmem %s19_s30, 32  ;;  %p609_p12 = scmp.lt.s32.totalorder %s19_s30, %s19_s30 }
  0x1c   :  { %p605_p11 = scmp.ne.s32.totalorder %s19_s30, %s604_s1  ;;  %p610_p13 = scmp.lt.s32.totalorder %s604_s1, %s604_s1 }
  0x1e   :  { %p611_p0 = por %p610_p13, %p609_p12 }
  0x20   :  { %p612_p1 = pnand %p611_p0, %p605_p11 }
  0x22   :  { %615 = shalt.err (!%p612_p1)
}
  0x23   :  { %21 = dma.hbm_to_vmem [thread:$0]  %s789_s0, 32, %s19_s30, [#allocation3]  }
  0x24   :  { %s616_s18 = scalar_lea.hbm %s792_s3, 2048 }
  0x25   :  { %p617_p2 = scmp.ne.s32.totalorder %s792_s3, %s616_s18  ;;  %p620_p3 = scmp.lt.u32.totalorder %s616_s18, %s792_s3 }
  0x27   :  { %p622_p4 = pnand %p620_p3, %p617_p2 }
  0x29   :  { %625 = shalt.err (!%p622_p4)
}
  0x2a   :  { %s626_s23 = scalar_lea.vmem %s42_s6, 2048  ;;  %p631_p6 = scmp.lt.s32.totalorder %s42_s6, %s42_s6 }
  0x2b   :  { %p627_p5 = scmp.ne.s32.totalorder %s42_s6, %s626_s23  ;;  %p632_p7 = scmp.lt.s32.totalorder %s626_s23, %s626_s23 }
  0x2d   :  { %p633_p8 = por %p632_p7, %p631_p6 }
  0x2f   :  { %p634_p9 = pnand %p633_p8, %p627_p5 }
  0x31   :  { %637 = shalt.err (!%p634_p9)
}
  0x32   :  { %s671_s0 = smov 128   ;;  %s672_s24 = smov 8  }
  0x33   :  { %47 = dma.hbm_to_vmem [thread:$0]  %s792_s3, 2048, %s42_s6, [#allocation6], %s671_s0, %s671_s0, %s672_s24  }
  0x34   :  { %660 = dma.done.wait [#allocation3], 32  }
  0x35   :  { %661 = vsyncadd [#allocation3], 4294967264 }
  0x36   :  { %662 = dma.done.wait [#allocation6], 3072  }
  0x37   :  { %663 = vsyncadd [#allocation6], 4294964224  ;;  %v673_v0 = vmov 0.0   ;;  %vm674_vm0 = vmmov 0   ;;  %v675_v1 = vmov 0.0|0.0   ;;  %v562_v2 = vld [vmem:[#allocation5] sm:$0xff]  }
  0x38   :  { %413 = vmatprep.subr.bf16.mxu0 %v673_v0  ;;  %429 = vmatprep.mubr.msk.bf16.mxu0 %vm674_vm0, %v673_v0  ;;  %v563_v3 = vld [vmem:[#allocation5 + $0x8] sm:$0xff]   ;;  %v564_v4 = vld [vmem:[#allocation5 + $0x10] sm:$0xff]   ;;  %v172_v5 = vld [vmem:[#allocation7] sm:$0xff]  ;;  %s676_s6 = smov [#allocation8]  }
  0x39   :  { %503 = vmatprep.subr.bf16.mxu1 %v675_v1  ;;  %465 = vmatprep.mubr.msk.f32.mxu1 %vm674_vm0, %v673_v0  ;;  %v173_v6 = vld [vmem:[#allocation7 + $0x8] sm:$0xff]  ;;  %v174_v8 = vld [vmem:[#allocation7 + $0x10] sm:$0xff]  ;;  %v175_v9 = vld [vmem:[#allocation7 + $0x18] sm:$0xff]  ;;  %s349_s7 = sshll.u32 %s676_s6, 4  ;;  %s350_s7 = int_to_ptr.vmem [resolvable:$true] %s349_s7 }
  0x3a   :  { %414 = vmatpush3.bf16.msra.mxu0 %v562_v2  ;;  %v504_v7 = vpack.c.bf16 %v173_v6, %v172_v5  ;;  %v565_v10 = vld [vmem:[#allocation5 + $0x18] sm:$0xff]   ;;  %v507_v11 = vpack.c.bf16 %v175_v9, %v174_v8  ;;  %v176_v12 = vld [vmem:[#allocation7 + $0x20] sm:$0xff]  ;;  %v177_v13 = vld [vmem:[#allocation7 + $0x28] sm:$0xff]  ;;  %s638_s8 = scalar_lea.vmem %s350_s7, 32  ;;  %p643_p11 = scmp.lt.s32.totalorder %s350_s7, %s350_s7 }
  0x3b   :  { %415 = vmatprep.subr.bf16.mxu0 %v673_v0  ;;  %v566_v14 = vld [vmem:[#allocation5 + $0x20] sm:$0xff]   ;;  %v510_v15 = vpack.c.bf16 %v177_v13, %v176_v12  ;;  %v178_v16 = vld [vmem:[#allocation7 + $0x30] sm:$0xff]  ;;  %v179_v17 = vld [vmem:[#allocation7 + $0x38] sm:$0xff]  ;;  %p639_p10 = scmp.ne.s32.totalorder %s350_s7, %s638_s8  ;;  %p644_p12 = scmp.lt.s32.totalorder %s638_s8, %s638_s8 }
  0x3c   :  { %505 = vmatpush3.bf16.msra.mxu1 %v504_v7  ;;  %v567_v18 = vld [vmem:[#allocation5 + $0x28] sm:$0xff]   ;;  %v513_v19 = vpack.c.bf16 %v179_v17, %v178_v16  ;;  %v180_v20 = vld [vmem:[#allocation7 + $0x40] sm:$0xff]  ;;  %v568_v22 = vld [vmem:[#allocation5 + $0x30] sm:$0xff]  }
  0x3d   :  { %506 = vmatprep.subr.bf16.mxu1 %v675_v1  ;;  %v181_v21 = vld [vmem:[#allocation7 + $0x48] sm:$0xff]  ;;  %v182_v24 = vld [vmem:[#allocation7 + $0x50] sm:$0xff]  ;;  %v183_v25 = vld [vmem:[#allocation7 + $0x58] sm:$0xff]  ;;  %p645_p13 = por %p644_p12, %p643_p11 }
  0x3e   :  { %416 = vmatpush3.bf16.msra.mxu0 %v563_v3  ;;  %v516_v23 = vpack.c.bf16 %v181_v21, %v180_v20  ;;  %v569_v26 = vld [vmem:[#allocation5 + $0x38] sm:$0xff]   ;;  %v519_v28 = vpack.c.bf16 %v183_v25, %v182_v24  ;;  %v184_v29 = vld [vmem:[#allocation7 + $0x60] sm:$0xff]  ;;  %v185_v30 = vld [vmem:[#allocation7 + $0x68] sm:$0xff] }
  0x3f   :  { %417 = vmatprep.subr.bf16.mxu0 %v673_v0  ;;  %v58_v27 = vld [vmem:[#allocation2] sm:$0x3]  ;;  %v522_v32 = vpack.c.bf16 %v185_v30, %v184_v29  ;;  %v186_v33 = vld [vmem:[#allocation7 + $0x70] sm:$0xff]  ;;  %v369_v53 = vld [vmem:[%s791_s2 + $0x2] ss:$0 sm:$0xff]  ;;  %p646_p0 = pnand %p645_p13, %p639_p10 }
  0x40   :  { %508 = vmatpush3.bf16.msra.mxu1 %v507_v11  ;;  %v62_v31 = vpack.c.bf16 %v58_v27, %v58_v27  ;;  %v187_v34 = vld [vmem:[#allocation7 + $0x78] sm:$0xff]  ;;  %v359_v36 = vld [vmem:[%s791_s2] ss:$0 sm:$0xff]  ;;  %v368_v51 = vld [vmem:[%s791_s2 + $0x1] ss:$0 sm:$0xff] }
  0x41   :  { %509 = vmatprep.subr.bf16.mxu1 %v675_v1  ;;  %v525_v35 = vpack.c.bf16 %v187_v34, %v186_v33 }
  0x42   :  { %418 = vmatpush3.bf16.msra.mxu0 %v564_v4 }
  0x43   :  { %419 = vmatprep.subr.bf16.mxu0 %v673_v0 }
  0x44   :  { %511 = vmatpush3.bf16.msra.mxu1 %v510_v15 }
  0x45   :  { %512 = vmatprep.subr.bf16.mxu1 %v675_v1 }
  0x46   :  { %420 = vmatpush3.bf16.msra.mxu0 %v565_v10 }
  0x47   :  { %421 = vmatprep.subr.bf16.mxu0 %v673_v0 }
  0x48   :  { %514 = vmatpush3.bf16.msra.mxu1 %v513_v19 }
  0x49   :  { %515 = vmatprep.subr.bf16.mxu1 %v675_v1 }
  0x4a   :  { %422 = vmatpush3.bf16.msra.mxu0 %v566_v14 }
  0x4b   :  { %423 = vmatprep.subr.bf16.mxu0 %v673_v0 }
  0x4c   :  { %517 = vmatpush3.bf16.msra.mxu1 %v516_v23 }
  0x4d   :  { %518 = vmatprep.subr.bf16.mxu1 %v675_v1 }
  0x4e   :  { %424 = vmatpush3.bf16.msra.mxu0 %v567_v18 }
  0x4f   :  { %425 = vmatprep.subr.bf16.mxu0 %v673_v0 }
  0x50   :  { %520 = vmatpush3.bf16.msra.mxu1 %v519_v28 }
  0x51   :  { %521 = vmatprep.subr.bf16.mxu1 %v675_v1 }
  0x52   :  { %426 = vmatpush3.bf16.msra.mxu0 %v568_v22 }
  0x53   :  { %427 = vmatprep.subr.bf16.mxu0 %v673_v0 }
  0x54   :  { %523 = vmatpush3.bf16.msra.mxu1 %v522_v32 }
  0x55   :  { %524 = vmatprep.subr.bf16.mxu1 %v675_v1 }
  0x56   :  { %428 = vmatpush3.bf16.msra.mxu0 %v569_v26 }
  0x57   :  { %527 = vmatprep.subr.bf16.mxu0 %v675_v1 }
  0x58   :  { %526 = vmatpush3.bf16.msra.mxu1 %v525_v35 }
  0x59   :  { %430 = vmatmul.mubr.bf16.vlgmr.msra.gmra.mrb[0].mxu0 %v62_v31 }
  0x5a   :  { %529 = vmatpush3.bf16.msra.mxu0 %v504_v7  ;;  %500 = vmatprep.mubr.msk.f32.mxu0 %vm674_vm0, %v673_v0 }
  0x5b   :  { %530 = vmatprep.subr.bf16.mxu0 %v675_v1 }
  0x5e   :  { %532 = vmatpush3.bf16.msra.mxu0 %v507_v11 }
  0x5f   :  { %533 = vmatprep.subr.bf16.mxu0 %v675_v1 }
  0x62   :  { %535 = vmatpush3.bf16.msra.mxu0 %v510_v15 }
  0x63   :  { %536 = vmatprep.subr.bf16.mxu0 %v675_v1 }
  0x66   :  { %538 = vmatpush3.bf16.msra.mxu0 %v513_v19 }
  0x67   :  { %539 = vmatprep.subr.bf16.mxu0 %v675_v1 }
  0x6a   :  { %541 = vmatpush3.bf16.msra.mxu0 %v516_v23 }
  0x6b   :  { %542 = vmatprep.subr.bf16.mxu0 %v675_v1 }
  0x6e   :  { %544 = vmatpush3.bf16.msra.mxu0 %v519_v28 }
  0x6f   :  { %545 = vmatprep.subr.bf16.mxu0 %v675_v1 }
  0x72   :  { %547 = vmatpush3.bf16.msra.mxu0 %v522_v32 }
  0x73   :  { %548 = vmatprep.subr.bf16.mxu0 %v675_v1 }
  0x76   :  { %550 = vmatpush3.bf16.msra.mxu0 %v525_v35 }
 0x12c   :  { %v165_v37 = vpop.f32.mrb[0].mxu0 }
 0x12d   :  { %v166_v38 = vadd.f32 %v359_v36, %v165_v37  ;;  %v431_v39 = vpop.f32.mrb[1].mxu0 }
 0x12e   :  { %v168_v40 = vpop.f32.mrb[2].mxu0 }
 0x12f   :  { %v171_v41 = vadd.f32 %v166_v38, %v58_v27  ;;  %v432_v42 = vpop.f32.mrb[3].mxu0 }
 0x131   :  { %466 = vmatmul.mubr.f32.vlgmr.msra.gmra.mrb[0].mxu1 %v171_v41 }
 0x204   :  { %v254_v43 = vpop.f32.mrb[0].mxu1 }
 0x205   :  { %v258_v44 = vsub.f32 %v171_v41, %v254_v43  ;;  %v467_v45 = vpop.f32.mrb[1].mxu1 }
 0x207   :  { %v259_v46 = vmul.f32 %v258_v44, %v258_v44 }
 0x209   :  { %501 = vmatmul.mubr.f32.vlgmr.msra.gmra.mrb[4].mxu0 %v259_v46 }
 0x2dc   :  { %v326_v47 = vpop.f32.mrb[4].mxu0 }
 0x2dd   :  { %v327_v48 = vadd.f32 1e-05, %v326_v47  ;;  %v502_v49 = vpop.f32.mrb[5].mxu0 }
 0x2df   :  { %570 = vrsqrt.f32 %v327_v48 }
 0x2e9   :  { %v571_v50 = vpop.eup %570 }
 0x2ea   :  { %v331_v52 = vmul.f32 %v571_v50, %v258_v44 }
 0x2ec   :  { %v336_v54 = vmul.f32 %v368_v51, %v331_v52 }
 0x2ee   :  { %v341_v55 = vadd.f32 %v369_v53, %v336_v54 }
 0x2f0   :  { %342 = vst [vmem:[#allocation8] sm:$0x3] %v341_v55 }
 0x2f1   :  { %649 = shalt.err (!%p646_p0)
}
 0x2f2   :  { %s650_s11 = scalar_lea.hbm %s793_s4, 32 }
 0x2f3   :  { %p651_p1 = scmp.ne.s32.totalorder %s793_s4, %s650_s11  ;;  %p654_p2 = scmp.lt.u32.totalorder %s650_s11, %s793_s4 }
 0x2f5   :  { %p656_p3 = pnand %p654_p2, %p651_p1 }
 0x2f7   :  { %659 = shalt.err (!%p656_p3)
}
 0x2f8   :  { %352 = dma.vmem_to_hbm [thread:$0]  %s350_s7, 32, %s793_s4, [#allocation4]  }
 0x2f9   :  { %664 = dma.done.wait [#allocation4], 32  }
 0x2fa   :  { %665 = vsyncadd [#allocation4], 4294967264 }
 0x2fb   :  { %356 = vsyncpa [#allocation3], 1 }
 0x2fc   :  { %357 = vsyncpa [#allocation6], 1 }
 0x2fd   :  { %358 = vsyncpa [#allocation4], 1 }

// kernel: tpu_custom_call.1
= control target key start
LH: loop header
LB: loop body
LE: loop exit
PB: predicated region body
PF: predicated region fallthrough
CT: control target
= control target key end

     0   :  { %9 = vsyncpa [#allocation3], 0  ;;  %s789_s0 = inlined_call_operand.hbm [shape: f32[2,128], index: 0, kind: input, shape index: {}]   ;;  %s790_s1 = inlined_call_operand.hbm [shape: bf16[128,128], index: 1, kind: input, shape index: {}]   ;;  %s791_s2 = inlined_call_operand.vmem [shape: f32[3,128], index: 2, kind: input, shape index: {}]   ;;  %s792_s3 = inlined_call_operand.hbm [shape: f32[128,128], index: 3, kind: input, shape index: {}]   ;;  %s793_s4 = inlined_call_operand.hbm [shape: f32[2,128], index: 4, kind: output, shape index: {}]  }
   0x1   :  { %10 = vsyncpa [#allocation6], 0 }
   0x2   :  { %11 = vsyncpa [#allocation4], 0  ;;  %s666_s15 = smov [#allocation5]   ;;  %s572_s19 = scalar_lea.hbm %s790_s1, 1024 }
   0x3   :  { %s27_s16 = sshll.u32 %s666_s15, 4  ;;  %p573_p0 = scmp.ne.s32.totalorder %s790_s1, %s572_s19  ;;  %s28_s16 = int_to_ptr.vmem [resolvable:$true] %s27_s16 }
   0x4   :  { %p576_p1 = scmp.lt.u32.totalorder %s572_s19, %s790_s1 }
   0x6   :  { %p578_p2 = pnand %p576_p1, %p573_p0 }
   0x8   :  { %581 = shalt.err (!%p578_p2)
}
   0x9   :  { %s582_s24 = scalar_lea.vmem %s28_s16, 1024  ;;  %p587_p4 = scmp.lt.s32.totalorder %s28_s16, %s28_s16 }
   0xa   :  { %p583_p3 = scmp.ne.s32.totalorder %s28_s16, %s582_s24  ;;  %p588_p5 = scmp.lt.s32.totalorder %s582_s24, %s582_s24 }
   0xc   :  { %p589_p6 = por %p588_p5, %p587_p4 }
   0xe   :  { %p590_p7 = pnand %p589_p6, %p583_p3 }
  0x10   :  { %593 = shalt.err (!%p590_p7)
}
  0x11   :  { %s667_s25 = smov 64   ;;  %s668_s26 = smov 4  }
  0x12   :  { %33 = dma.hbm_to_vmem [thread:$0]  %s790_s1, 1024, %s28_s16, [#allocation6], %s667_s25, %s667_s25, %s668_s26  }
  0x13   :  { %s669_s29 = smov [#allocation2]   ;;  %s670_s5 = smov [#allocation7]  }
  0x14   :  { %s18_s30 = sshll.u32 %s669_s29, 4  ;;  %s41_s6 = sshll.u32 %s670_s5, 4  ;;  %s19_s30 = int_to_ptr.vmem [resolvable:$true] %s18_s30  ;;  %s42_s6 = int_to_ptr.vmem [resolvable:$true] %s41_s6 }
  0x15   :  { %s594_s9 = scalar_lea.hbm %s789_s0, 32 }
  0x16   :  { %p595_p8 = scmp.ne.s32.totalorder %s789_s0, %s594_s9  ;;  %p598_p9 = scmp.lt.u32.totalorder %s594_s9, %s789_s0 }
  0x18   :  { %p600_p10 = pnand %p598_p9, %p595_p8 }
  0x1a   :  { %603 = shalt.err (!%p600_p10)
}
  0x1b   :  { %s604_s1 = scalar_lea.vmem %s19_s30, 32  ;;  %p609_p12 = scmp.lt.s32.totalorder %s19_s30, %s19_s30 }
  0x1c   :  { %p605_p11 = scmp.ne.s32.totalorder %s19_s30, %s604_s1  ;;  %p610_p13 = scmp.lt.s32.totalorder %s604_s1, %s604_s1 }
  0x1e   :  { %p611_p0 = por %p610_p13, %p609_p12 }
  0x20   :  { %p612_p1 = pnand %p611_p0, %p605_p11 }
  0x22   :  { %615 = shalt.err (!%p612_p1)
}
  0x23   :  { %21 = dma.hbm_to_vmem [thread:$0]  %s789_s0, 32, %s19_s30, [#allocation3]  }
  0x24   :  { %s616_s18 = scalar_lea.hbm %s792_s3, 2048 }
  0x25   :  { %p617_p2 = scmp.ne.s32.totalorder %s792_s3, %s616_s18  ;;  %p620_p3 = scmp.lt.u32.totalorder %s616_s18, %s792_s3 }
  0x27   :  { %p622_p4 = pnand %p620_p3, %p617_p2 }
  0x29   :  { %625 = shalt.err (!%p622_p4)
}
  0x2a   :  { %s626_s23 = scalar_lea.vmem %s42_s6, 2048  ;;  %p631_p6 = scmp.lt.s32.totalorder %s42_s6, %s42_s6 }
  0x2b   :  { %p627_p5 = scmp.ne.s32.totalorder %s42_s6, %s626_s23  ;;  %p632_p7 = scmp.lt.s32.totalorder %s626_s23, %s626_s23 }
  0x2d   :  { %p633_p8 = por %p632_p7, %p631_p6 }
  0x2f   :  { %p634_p9 = pnand %p633_p8, %p627_p5 }
  0x31   :  { %637 = shalt.err (!%p634_p9)
}
  0x32   :  { %s671_s0 = smov 128   ;;  %s672_s24 = smov 8  }
  0x33   :  { %47 = dma.hbm_to_vmem [thread:$0]  %s792_s3, 2048, %s42_s6, [#allocation6], %s671_s0, %s671_s0, %s672_s24  }
  0x34   :  { %660 = dma.done.wait [#allocation3], 32  }
  0x35   :  { %661 = vsyncadd [#allocation3], 4294967264 }
  0x36   :  { %662 = dma.done.wait [#allocation6], 3072  }
  0x37   :  { %663 = vsyncadd [#allocation6], 4294964224  ;;  %v673_v0 = vmov 0.0   ;;  %vm674_vm0 = vmmov 0   ;;  %v675_v1 = vmov 0.0|0.0   ;;  %v562_v2 = vld [vmem:[#allocation5] sm:$0xff]  }
  0x38   :  { %413 = vmatprep.subr.bf16.mxu0 %v673_v0  ;;  %429 = vmatprep.mubr.msk.bf16.mxu0 %vm674_vm0, %v673_v0  ;;  %v563_v3 = vld [vmem:[#allocation5 + $0x8] sm:$0xff]   ;;  %v564_v4 = vld [vmem:[#allocation5 + $0x10] sm:$0xff]   ;;  %v172_v5 = vld [vmem:[#allocation7] sm:$0xff]  ;;  %s676_s6 = smov [#allocation8]  }
  0x39   :  { %503 = vmatprep.subr.bf16.mxu1 %v675_v1  ;;  %465 = vmatprep.mubr.msk.f32.mxu1 %vm674_vm0, %v673_v0  ;;  %v173_v6 = vld [vmem:[#allocation7 + $0x8] sm:$0xff]  ;;  %v174_v8 = vld [vmem:[#allocation7 + $0x10] sm:$0xff]  ;;  %v175_v9 = vld [vmem:[#allocation7 + $0x18] sm:$0xff]  ;;  %s349_s7 = sshll.u32 %s676_s6, 4  ;;  %s350_s7 = int_to_ptr.vmem [resolvable:$true] %s349_s7 }
  0x3a   :  { %414 = vmatpush3.bf16.msra.mxu0 %v562_v2  ;;  %v504_v7 = vpack.c.bf16 %v173_v6, %v172_v5  ;;  %v565_v10 = vld [vmem:[#allocation5 + $0x18] sm:$0xff]   ;;  %v507_v11 = vpack.c.bf16 %v175_v9, %v174_v8  ;;  %v176_v12 = vld [vmem:[#allocation7 + $0x20] sm:$0xff]  ;;  %v177_v13 = vld [vmem:[#allocation7 + $0x28] sm:$0xff]  ;;  %s638_s8 = scalar_lea.vmem %s350_s7, 32  ;;  %p643_p11 = scmp.lt.s32.totalorder %s350_s7, %s350_s7 }
  0x3b   :  { %415 = vmatprep.subr.bf16.mxu0 %v673_v0  ;;  %v566_v14 = vld [vmem:[#allocation5 + $0x20] sm:$0xff]   ;;  %v510_v15 = vpack.c.bf16 %v177_v13, %v176_v12  ;;  %v178_v16 = vld [vmem:[#allocation7 + $0x30] sm:$0xff]  ;;  %v179_v17 = vld [vmem:[#allocation7 + $0x38] sm:$0xff]  ;;  %p639_p10 = scmp.ne.s32.totalorder %s350_s7, %s638_s8  ;;  %p644_p12 = scmp.lt.s32.totalorder %s638_s8, %s638_s8 }
  0x3c   :  { %505 = vmatpush3.bf16.msra.mxu1 %v504_v7  ;;  %v567_v18 = vld [vmem:[#allocation5 + $0x28] sm:$0xff]   ;;  %v513_v19 = vpack.c.bf16 %v179_v17, %v178_v16  ;;  %v180_v20 = vld [vmem:[#allocation7 + $0x40] sm:$0xff]  ;;  %v568_v22 = vld [vmem:[#allocation5 + $0x30] sm:$0xff]  }
  0x3d   :  { %506 = vmatprep.subr.bf16.mxu1 %v675_v1  ;;  %v181_v21 = vld [vmem:[#allocation7 + $0x48] sm:$0xff]  ;;  %v182_v24 = vld [vmem:[#allocation7 + $0x50] sm:$0xff]  ;;  %v183_v25 = vld [vmem:[#allocation7 + $0x58] sm:$0xff]  ;;  %p645_p13 = por %p644_p12, %p643_p11 }
  0x3e   :  { %416 = vmatpush3.bf16.msra.mxu0 %v563_v3  ;;  %v516_v23 = vpack.c.bf16 %v181_v21, %v180_v20  ;;  %v569_v26 = vld [vmem:[#allocation5 + $0x38] sm:$0xff]   ;;  %v519_v28 = vpack.c.bf16 %v183_v25, %v182_v24  ;;  %v184_v29 = vld [vmem:[#allocation7 + $0x60] sm:$0xff]  ;;  %v185_v30 = vld [vmem:[#allocation7 + $0x68] sm:$0xff] }
  0x3f   :  { %417 = vmatprep.subr.bf16.mxu0 %v673_v0  ;;  %v58_v27 = vld [vmem:[#allocation2] sm:$0x3]  ;;  %v522_v32 = vpack.c.bf16 %v185_v30, %v184_v29  ;;  %v186_v33 = vld [vmem:[#allocation7 + $0x70] sm:$0xff]  ;;  %v369_v53 = vld [vmem:[%s791_s2 + $0x2] ss:$0 sm:$0xff]  ;;  %p646_p0 = pnand %p645_p13, %p639_p10 }
  0x40   :  { %508 = vmatpush3.bf16.msra.mxu1 %v507_v11  ;;  %v62_v31 = vpack.c.bf16 %v58_v27, %v58_v27  ;;  %v187_v34 = vld [vmem:[#allocation7 + $0x78] sm:$0xff]  ;;  %v359_v36 = vld [vmem:[%s791_s2] ss:$0 sm:$0xff]  ;;  %v368_v51 = vld [vmem:[%s791_s2 + $0x1] ss:$0 sm:$0xff] }
  0x41   :  { %509 = vmatprep.subr.bf16.mxu1 %v675_v1  ;;  %v525_v35 = vpack.c.bf16 %v187_v34, %v186_v33 }
  0x42   :  { %418 = vmatpush3.bf16.msra.mxu0 %v564_v4 }
  0x43   :  { %419 = vmatprep.subr.bf16.mxu0 %v673_v0 }
  0x44   :  { %511 = vmatpush3.bf16.msra.mxu1 %v510_v15 }
  0x45   :  { %512 = vmatprep.subr.bf16.mxu1 %v675_v1 }
  0x46   :  { %420 = vmatpush3.bf16.msra.mxu0 %v565_v10 }
  0x47   :  { %421 = vmatprep.subr.bf16.mxu0 %v673_v0 }
  0x48   :  { %514 = vmatpush3.bf16.msra.mxu1 %v513_v19 }
  0x49   :  { %515 = vmatprep.subr.bf16.mxu1 %v675_v1 }
  0x4a   :  { %422 = vmatpush3.bf16.msra.mxu0 %v566_v14 }
  0x4b   :  { %423 = vmatprep.subr.bf16.mxu0 %v673_v0 }
  0x4c   :  { %517 = vmatpush3.bf16.msra.mxu1 %v516_v23 }
  0x4d   :  { %518 = vmatprep.subr.bf16.mxu1 %v675_v1 }
  0x4e   :  { %424 = vmatpush3.bf16.msra.mxu0 %v567_v18 }
  0x4f   :  { %425 = vmatprep.subr.bf16.mxu0 %v673_v0 }
  0x50   :  { %520 = vmatpush3.bf16.msra.mxu1 %v519_v28 }
  0x51   :  { %521 = vmatprep.subr.bf16.mxu1 %v675_v1 }
  0x52   :  { %426 = vmatpush3.bf16.msra.mxu0 %v568_v22 }
  0x53   :  { %427 = vmatprep.subr.bf16.mxu0 %v673_v0 }
  0x54   :  { %523 = vmatpush3.bf16.msra.mxu1 %v522_v32 }
  0x55   :  { %524 = vmatprep.subr.bf16.mxu1 %v675_v1 }
  0x56   :  { %428 = vmatpush3.bf16.msra.mxu0 %v569_v26 }
  0x57   :  { %527 = vmatprep.subr.bf16.mxu0 %v675_v1 }
  0x58   :  { %526 = vmatpush3.bf16.msra.mxu1 %v525_v35 }
  0x59   :  { %430 = vmatmul.mubr.bf16.vlgmr.msra.gmra.mrb[0].mxu0 %v62_v31 }
  0x5a   :  { %529 = vmatpush3.bf16.msra.mxu0 %v504_v7  ;;  %500 = vmatprep.mubr.msk.f32.mxu0 %vm674_vm0, %v673_v0 }
  0x5b   :  { %530 = vmatprep.subr.bf16.mxu0 %v675_v1 }
  0x5e   :  { %532 = vmatpush3.bf16.msra.mxu0 %v507_v11 }
  0x5f   :  { %533 = vmatprep.subr.bf16.mxu0 %v675_v1 }
  0x62   :  { %535 = vmatpush3.bf16.msra.mxu0 %v510_v15 }
  0x63   :  { %536 = vmatprep.subr.bf16.mxu0 %v675_v1 }
  0x66   :  { %538 = vmatpush3.bf16.msra.mxu0 %v513_v19 }
  0x67   :  { %539 = vmatprep.subr.bf16.mxu0 %v675_v1 }
  0x6a   :  { %541 = vmatpush3.bf16.msra.mxu0 %v516_v23 }
  0x6b   :  { %542 = vmatprep.subr.bf16.mxu0 %v675_v1 }
  0x6e   :  { %544 = vmatpush3.bf16.msra.mxu0 %v519_v28 }
  0x6f   :  { %545 = vmatprep.subr.bf16.mxu0 %v675_v1 }
  0x72   :  { %547 = vmatpush3.bf16.msra.mxu0 %v522_v32 }
  0x73   :  { %548 = vmatprep.subr.bf16.mxu0 %v675_v1 }
  0x76   :  { %550 = vmatpush3.bf16.msra.mxu0 %v525_v35 }
 0x12c   :  { %v165_v37 = vpop.f32.mrb[0].mxu0 }
 0x12d   :  { %v166_v38 = vadd.f32 %v359_v36, %v165_v37  ;;  %v431_v39 = vpop.f32.mrb[1].mxu0 }
 0x12e   :  { %v168_v40 = vpop.f32.mrb[2].mxu0 }
 0x12f   :  { %v171_v41 = vadd.f32 %v166_v38, %v58_v27  ;;  %v432_v42 = vpop.f32.mrb[3].mxu0 }
 0x131   :  { %466 = vmatmul.mubr.f32.vlgmr.msra.gmra.mrb[0].mxu1 %v171_v41 }
 0x204   :  { %v254_v43 = vpop.f32.mrb[0].mxu1 }
 0x205   :  { %v258_v44 = vsub.f32 %v171_v41, %v254_v43  ;;  %v467_v45 = vpop.f32.mrb[1].mxu1 }
 0x207   :  { %v259_v46 = vmul.f32 %v258_v44, %v258_v44 }
 0x209   :  { %501 = vmatmul.mubr.f32.vlgmr.msra.gmra.mrb[4].mxu0 %v259_v46 }
 0x2dc   :  { %v326_v47 = vpop.f32.mrb[4].mxu0 }
 0x2dd   :  { %v327_v48 = vadd.f32 1e-05, %v326_v47  ;;  %v502_v49 = vpop.f32.mrb[5].mxu0 }
 0x2df   :  { %570 = vrsqrt.f32 %v327_v48 }
 0x2e9   :  { %v571_v50 = vpop.eup %570 }
 0x2ea   :  { %v331_v52 = vmul.f32 %v571_v50, %v258_v44 }
 0x2ec   :  { %v336_v54 = vmul.f32 %v368_v51, %v331_v52 }
 0x2ee   :  { %v341_v55 = vadd.f32 %v369_v53, %v336_v54 }
 0x2f0   :  { %342 = vst [vmem:[#allocation8] sm:$0x3] %v341_v55 }
 0x2f1   :  { %649 = shalt.err (!%p646_p0)
}
 0x2f2   :  { %s650_s11 = scalar_lea.hbm %s793_s4, 32 }
 0x2f3   :  { %p651_p1 = scmp.ne.s32.totalorder %s793_s4, %s650_s11  ;;  %p654_p2 = scmp.lt.u32.totalorder %s650_s11, %s793_s4 }
 0x2f5   :  { %p656_p3 = pnand %p654_p2, %p651_p1 }
 0x2f7   :  { %659 = shalt.err (!%p656_p3)
}
 0x2f8   :  { %352 = dma.vmem_to_hbm [thread:$0]  %s350_s7, 32, %s793_s4, [#allocation4]  }
 0x2f9   :  { %664 = dma.done.wait [#allocation4], 32  }
 0x2fa   :  { %665 = vsyncadd [#allocation4], 4294967264 }
 0x2fb   :  { %356 = vsyncpa [#allocation3], 1 }
 0x2fc   :  { %357 = vsyncpa [#allocation6], 1 }
 0x2fd   :  { %358 = vsyncpa [#allocation4], 1 }

</bundles_post_ra>
